<compile_context>
chip_gen: v7x
topology: tpu7x:2x2x1
jax: 0.10.0
libtpu: 0.0.40
codegen_flags: <defaults>
</compile_context>

<pallas_src>
import jax
import jax.numpy as jnp
from jax.experimental import pallas as pl
from jax.experimental.pallas import tpu as pltpu

EPS = 1e-5  # torch.nn.InstanceNorm2d default eps


def adain_kernel(x_ref, gamma_ref, beta_ref, o_ref):
    # x_ref:     (TR, HW)  rows = flattened (n, c), lanes = flattened spatial
    # gamma_ref: (TR, 1)
    # beta_ref:  (TR, 1)
    # o_ref:     (TR, HW)
    x = x_ref[...].astype(jnp.float32)

    hw = x.shape[1]
    inv_hw = jnp.float32(1.0 / hw)

    # fused single-pass statistics: sum(x) and sum(x*x)  (lane reductions -> XLU)
    s1 = jnp.sum(x, axis=1, keepdims=True)          # (TR, 1)
    s2 = jnp.sum(x * x, axis=1, keepdims=True)      # (TR, 1)
    mean = s1 * inv_hw
    var = jnp.maximum(s2 * inv_hw - mean * mean, 0.0)

    inv_std = jax.lax.rsqrt(var + EPS)              # (TR, 1)  (EUP)
    gamma = gamma_ref[...].astype(jnp.float32)      # (TR, 1)
    beta = beta_ref[...].astype(jnp.float32)        # (TR, 1)

    # fold normalization + adaptive affine into one FMA per element
    scale = gamma * inv_std
    shift = beta - scale * mean
    o_ref[...] = (x * scale + shift).astype(o_ref.dtype)


_BLOCK_BYTES_BUDGET = 6 * 1024 * 1024  # ~6 MiB f32 per x block


def _pick_row_tile(rows, hw):
    """Rows per block: multiple of 8, ~6 MiB f32 per block, prefer >=2 grid steps."""
    budget_elems = _BLOCK_BYTES_BUDGET // 4
    cap = max(8, (budget_elems // max(hw, 1)) // 8 * 8)
    tr = min(cap, ((rows + 7) // 8) * 8)
    # keep at least 2 grid steps (megacore / v7x dual-TC) when rows allow
    if tr >= rows and rows > 8:
        half = (((rows + 1) // 2) + 7) // 8 * 8
        tr = max(8, min(tr, half))
    return tr


def adaptive_instance_norm(x, style, weight, bias, *, row_tile=None,
                           vmem_limit_bytes=None):
    """
    x:      (N, C, H, W)  float32
    style:  (N, S)        float32
    weight: (2C, S)       nn.Linear weight
    bias:   (2C,)         nn.Linear bias
    returns (N, C, H, W)
    """
    N, C, H, W = x.shape
    HW = H * W
    rows = N * C

    # --- style linear hoisted out of the kernel (one XLA matmul for all N) ---
    gb = (style.astype(jnp.float32) @ weight.astype(jnp.float32).T
          + bias.astype(jnp.float32))               # (N, 2C)
    gamma = gb[:, :C].reshape(rows, 1)              # (N*C, 1)
    beta = gb[:, C:].reshape(rows, 1)               # (N*C, 1)

    x_flat = x.reshape(rows, HW)

    if row_tile is None:
        row_tile = _pick_row_tile(rows, HW)
    grid = (pl.cdiv(rows, row_tile),)

    if vmem_limit_bytes is None:
        # in + out blocks, double-buffered, plus slack for gamma/beta & scratch
        block_bytes = row_tile * HW * 4
        needed = 4 * block_bytes + (2 << 20)
        if needed > (32 << 20):
            vmem_limit_bytes = min(needed, 100 << 20)

    out_flat = pl.pallas_call(
        adain_kernel,
        out_shape=jax.ShapeDtypeStruct((rows, HW), x.dtype),
        grid_spec=pltpu.PrefetchScalarGridSpec(
            num_scalar_prefetch=0,
            grid=grid,
            in_specs=[
                pl.BlockSpec((row_tile, HW), lambda r: (r, 0)),
                pl.BlockSpec((row_tile, 1), lambda r: (r, 0)),
                pl.BlockSpec((row_tile, 1), lambda r: (r, 0)),
            ],
            out_specs=pl.BlockSpec((row_tile, HW), lambda r: (r, 0)),
        ),
        compiler_params=pltpu.CompilerParams(
            dimension_semantics=("parallel",),
            vmem_limit_bytes=vmem_limit_bytes,
        ),
    )(x_flat, gamma, beta)

    return out_flat.reshape(N, C, H, W)


def reference_adain(x, style, weight, bias):
    # pure-JAX reference mirroring the PyTorch module
    N, C, H, W = x.shape
    gb = style @ weight.T + bias                 # (N, 2C)
    gamma = gb[:, :C][:, :, None, None]
    beta = gb[:, C:][:, :, None, None]
    mean = jnp.mean(x, axis=(2, 3), keepdims=True)
    var = jnp.mean((x - mean) ** 2, axis=(2, 3), keepdims=True)
    normed = (x - mean) / jnp.sqrt(var + EPS)
    return gamma * normed + beta


if __name__ == "__main__":
    N, C, H, W = 2, 4, 16, 16
    S = 32  # style_dim

    key = jax.random.PRNGKey(0)
    kx, ks, kw = jax.random.split(key, 3)

    x = jax.random.normal(kx, (N, C, H, W), dtype=jnp.float32)
    style = jax.random.normal(ks, (N, S), dtype=jnp.float32)

    # Deterministic "nn.Linear(style_dim, 2*C)" params:
    #   weight ~ U(-1/sqrt(S), 1/sqrt(S));  bias[:C] = 1, bias[C:] = 0
    bound = 1.0 / (S ** 0.5)
    weight = jax.random.uniform(kw, (2 * C, S), minval=-bound, maxval=bound,
                                dtype=jnp.float32)
    bias = jnp.concatenate([jnp.ones((C,), jnp.float32),
                            jnp.zeros((C,), jnp.float32)])

    out = adaptive_instance_norm(x, style, weight, bias)
    out = jax.block_until_ready(out)

    ref = reference_adain(x, style, weight, bias)
    assert out.shape == (N, C, H, W)
    assert jnp.allclose(out, ref, atol=1e-4, rtol=1e-4), "mismatch vs reference"

    print("KERNEL_OK")
</pallas_src>

<mosaic_0001>
module attributes {stable_mosaic.version = 11 : i64} {
  func.func @adain_kernel(%arg0: i32, %arg1: memref<8x256xf32, #tpu.memory_space<vmem>>, %arg2: memref<8x1xf32, #tpu.memory_space<vmem>>, %arg3: memref<8x1xf32, #tpu.memory_space<vmem>>, %arg4: memref<8x256xf32, #tpu.memory_space<vmem>>) attributes {dimension_semantics = [#tpu.dimension_semantics<parallel>], iteration_bounds = array<i64: 1>, scalar_prefetch = 0 : i64, scratch_operands = 0 : i64, tpu.core_type = #tpu.core_type<tc>, window_params = [{transform_indices = @transform_0, window_bounds = array<i64: 8, 256>}, {transform_indices = @transform_1, window_bounds = array<i64: 8, 1>}, {transform_indices = @transform_2, window_bounds = array<i64: 8, 1>}, {transform_indices = @transform_3, window_bounds = array<i64: 8, 256>}]} {
    %c0 = arith.constant 0 : index
    %c0_0 = arith.constant 0 : index
    %0 = vector.load %arg1[%c0, %c0_0] : memref<8x256xf32, #tpu.memory_space<vmem>>, vector<8x256xf32>
    %cst = arith.constant dense<0.000000e+00> : vector<8xf32>
    %1 = vector.multi_reduction <add>, %0, %cst [1] : vector<8x256xf32> to vector<8xf32>
    %2 = vector.shape_cast %1 : vector<8xf32> to vector<8x1xf32>
    %3 = arith.mulf %0, %0 : vector<8x256xf32>
    %cst_1 = arith.constant dense<0.000000e+00> : vector<8xf32>
    %4 = vector.multi_reduction <add>, %3, %cst_1 [1] : vector<8x256xf32> to vector<8xf32>
    %5 = vector.shape_cast %4 : vector<8xf32> to vector<8x1xf32>
    %cst_2 = arith.constant 3.906250e-03 : f32
    %6 = vector.broadcast %cst_2 : f32 to vector<8x1xf32>
    %7 = arith.mulf %2, %6 : vector<8x1xf32>
    %cst_3 = arith.constant 3.906250e-03 : f32
    %8 = vector.broadcast %cst_3 : f32 to vector<8x1xf32>
    %9 = arith.mulf %5, %8 : vector<8x1xf32>
    %10 = arith.mulf %7, %7 : vector<8x1xf32>
    %11 = arith.subf %9, %10 : vector<8x1xf32>
    %cst_4 = arith.constant 0.000000e+00 : f32
    %12 = vector.broadcast %cst_4 : f32 to vector<8x1xf32>
    %13 = arith.maximumf %11, %12 : vector<8x1xf32>
    %cst_5 = arith.constant 9.99999974E-6 : f32
    %14 = vector.broadcast %cst_5 : f32 to vector<8x1xf32>
    %15 = arith.addf %13, %14 : vector<8x1xf32>
    %16 = math.rsqrt %15 : vector<8x1xf32>
    %c0_6 = arith.constant 0 : index
    %c0_7 = arith.constant 0 : index
    %17 = vector.load %arg2[%c0_6, %c0_7] : memref<8x1xf32, #tpu.memory_space<vmem>>, vector<8x1xf32>
    %c0_8 = arith.constant 0 : index
    %c0_9 = arith.constant 0 : index
    %18 = vector.load %arg3[%c0_8, %c0_9] : memref<8x1xf32, #tpu.memory_space<vmem>>, vector<8x1xf32>
    %19 = arith.mulf %17, %16 : vector<8x1xf32>
    %20 = arith.mulf %19, %7 : vector<8x1xf32>
    %21 = arith.subf %18, %20 : vector<8x1xf32>
    %22 = vector.broadcast %19 : vector<8x1xf32> to vector<8x256xf32>
    %23 = arith.mulf %0, %22 : vector<8x256xf32>
    %24 = vector.broadcast %21 : vector<8x1xf32> to vector<8x256xf32>
    %25 = arith.addf %23, %24 : vector<8x256xf32>
    %c0_10 = arith.constant 0 : index
    %c0_11 = arith.constant 0 : index
    %26 = vector.load %arg4[%c0_10, %c0_11] : memref<8x256xf32, #tpu.memory_space<vmem>>, vector<8x256xf32>
    tpu.vector_store %arg4[%c0_10, %c0_11], %25 {strides = array<i32>} : memref<8x256xf32, #tpu.memory_space<vmem>>, vector<8x256xf32>,
    return
  }
  func.func @transform_0(%arg0: i32) -> (i32, i32) {
    %c0_i32 = arith.constant 0 : i32
    %c0_i32_0 = arith.constant 0 : i32
    return %arg0, %c0_i32 : i32, i32
  }
  func.func @transform_1(%arg0: i32) -> (i32, i32) {
    %c0_i32 = arith.constant 0 : i32
    %c0_i32_0 = arith.constant 0 : i32
    return %arg0, %c0_i32 : i32, i32
  }
  func.func @transform_2(%arg0: i32) -> (i32, i32) {
    %c0_i32 = arith.constant 0 : i32
    %c0_i32_0 = arith.constant 0 : i32
    return %arg0, %c0_i32 : i32, i32
  }
  func.func @transform_3(%arg0: i32) -> (i32, i32) {
    %c0_i32 = arith.constant 0 : i32
    %c0_i32_0 = arith.constant 0 : i32
    return %arg0, %c0_i32 : i32, i32
  }
}

</mosaic_0001>

<bundles_post_ra>
// kernel: tpu_custom_call.1
= control target key start
LH: loop header
LB: loop body
LE: loop exit
PB: predicated region body
PF: predicated region fallthrough
CT: control target
= control target key end

     0   :  { %s143_s0 = inlined_call_operand.vmem [shape: f32[8,256], index: 0, kind: input, shape index: {}]   ;;  %s144_s1 = inlined_call_operand.vmem [shape: f32[8,1], index: 1, kind: input, shape index: {}]   ;;  %s145_s2 = inlined_call_operand.vmem [shape: f32[8,1], index: 2, kind: input, shape index: {}]   ;;  %s146_s3 = inlined_call_operand.hbm [shape: f32[8,256], index: 3, kind: output, shape index: {}]  }
   0x1   :  { %v15_v0 = vld [vmem:[%s143_s0] sm:$0xff]  ;;  %v16_v1 = vld [vmem:[%s143_s0 + $0x8] sm:$0xff] }
   0x2   :  { %8 = vsyncpa [#allocation3], 0  ;;  %v17_v2 = vadd.f32 %v16_v1, %v15_v0  ;;  %v20_v3 = vmul.f32 %v15_v0, %v15_v0  ;;  %v21_v4 = vmul.f32 %v16_v1, %v16_v1  ;;  %v97_v6 = vmov 0   ;;  %v32_v15 = vld [vmem:[%s144_s1] sm:$0xff]  ;;  %s98_s19 = smov [#allocation2]  }
   0x3   :  { %69 = vset.pattern.permute.xlu1 %v97_v6  ;;  %70 = vset.pattern.permute.xlu0 %v97_v6  ;;  %v33_v18 = vld [vmem:[%s145_s2] sm:$0xff]  ;;  %s59_s20 = sshll.u32 %s98_s19, 4  ;;  %s60_s20 = int_to_ptr.vmem [resolvable:$true] %s59_s20 }
   0x4   :  { %18 = vadd.xlane.f32.xlu0 %v17_v2  ;;  %v22_v5 = vadd.f32 %v21_v4, %v20_v3  ;;  %s73_s1 = scalar_lea.vmem %s60_s20, 256  ;;  %p78_p1 = scmp.lt.s32.totalorder %s60_s20, %s60_s20 }
   0x5   :  { %p74_p0 = scmp.ne.s32.totalorder %s60_s20, %s73_s1  ;;  %p79_p2 = scmp.lt.s32.totalorder %s73_s1, %s73_s1 }
   0x7   :  { %p80_p3 = por %p79_p2, %p78_p1 }
   0x8   :  { %23 = vadd.xlane.f32.xlu0 %v22_v5 }
   0x9   :  { %p81_p4 = pnand %p80_p3, %p74_p0 }
  0x91   :  { %v19_v7 = vpop.xlane.xlu0 %18 }
  0x92   :  { %v25_v8 = vmul.f32 0.00390625, %v19_v7 }
  0x94   :  { %v27_v10 = vmul.f32 %v25_v8, %v25_v8 }
  0x95   :  { %v24_v9 = vpop.xlane.xlu0 %23 }
  0x96   :  { %v26_v11 = vmul.f32 0.00390625, %v24_v9 }
  0x98   :  { %v28_v12 = vsub.f32 %v26_v11, %v27_v10 }
  0x9a   :  { %v29_v13 = vmax.f32 %v28_v12, 0.0 }
  0x9c   :  { %v30_v14 = vadd.f32 1e-05, %v29_v13 }
  0x9e   :  { %71 = vrsqrt.f32 %v30_v14 }
  0xa8   :  { %v72_v16 = vpop.eup %71 }
  0xa9   :  { %v34_v17 = vmul.f32 %v72_v16, %v32_v15 }
  0xab   :  { %39 = vperm.xlu1 %69, %v34_v17   ;;  %v35_v19 = vmul.f32 %v34_v17, %v25_v8 }
  0xad   :  { %v36_v20 = vsub.f32 %v33_v18, %v35_v19 }
  0xaf   :  { %46 = vperm.xlu1 %69, %v36_v20  }
 0x12a   :  { %v40_v21 = vpop.permute.xlu1 %39 }
 0x12b   :  { %v42_v22 = vmul.f32 %v40_v21, %v15_v0  ;;  %v43_v23 = vmul.f32 %v40_v21, %v16_v1 }
 0x12e   :  { %v47_v24 = vpop.permute.xlu1 %46 }
 0x12f   :  { %v49_v25 = vadd.f32 %v47_v24, %v42_v22  ;;  %v50_v26 = vadd.f32 %v47_v24, %v43_v23 }
 0x131   :  { %51 = vst [vmem:[#allocation2] sm:$0xff] %v49_v25  ;;  %52 = vst [vmem:[#allocation2 + $0x8] sm:$0xff] %v50_v26 }
 0x132   :  { %84 = shalt.err (!%p81_p4)
}
 0x133   :  { %s85_s22 = scalar_lea.hbm %s146_s3, 256 }
 0x134   :  { %p86_p5 = scmp.ne.s32.totalorder %s146_s3, %s85_s22  ;;  %p89_p6 = scmp.lt.u32.totalorder %s85_s22, %s146_s3 }
 0x136   :  { %p91_p7 = pnand %p89_p6, %p86_p5 }
 0x138   :  { %94 = shalt.err (!%p91_p7)
}
 0x139   :  { %62 = dma.vmem_to_hbm [thread:$0]  %s60_s20, 256, %s146_s3, [#allocation3]  }
 0x13a   :  { %95 = dma.done.wait [#allocation3], 256  }
 0x13b   :  { %96 = vsyncadd [#allocation3], 4294967040 }
 0x13c   :  { %66 = vsyncpa [#allocation3], 1 }

</bundles_post_ra>
